<compile_context>
chip_gen: v7x
topology: tpu7x:2x2x1
jax: 0.10.0
libtpu: 0.0.40
codegen_flags: <defaults>
</compile_context>

<pallas_src>
import functools

import jax
import jax.numpy as jnp
from jax import lax
from jax.experimental import pallas as pl
from jax.experimental.pallas import tpu as pltpu


NUM_PARTIALS = 2  # leading "parallel" axis: sharded across TCs on v7x,
                  # serialized (negligible overhead) on 1-TC v5e/v6e.


def _confusion_kernel(logits_ref, tgt_ref, conf_ref, *, n_classes):
    """Accumulate a (C, C) confusion-matrix partial for one pixel tile.

    logits_ref : (1, C, tile_hw) f32 -- classes on sublanes, pixels on lanes
    tgt_ref    : (1, 1, tile_hw) i32
    conf_ref   : (1, C, C)       f32 -- partial histogram for this slice
    """
    b = pl.program_id(1)
    t = pl.program_id(2)

    @pl.when((b == 0) & (t == 0))
    def _():
        conf_ref[...] = jnp.zeros_like(conf_ref)

    logits = logits_ref[0]                                 # (C, tile_hw) f32
    tgt = tgt_ref[0]                                       # (1, tile_hw) i32

    # argmax over the class (sublane) axis, first-max tie-break (np.argmax).
    row = lax.broadcasted_iota(jnp.int32, logits.shape, 0)        # class ids
    mx = jnp.max(logits, axis=0, keepdims=True)                   # (1, tile_hw)
    is_max = logits == mx
    pred = jnp.min(jnp.where(is_max, row, n_classes), axis=0, keepdims=True)

    # Lane-dense one-hots in bf16 ({0,1} exact); invalid / padded targets
    # (anything outside [0, C)) contribute nothing, matching fast_hist's mask.
    pred_oh = (row == pred).astype(jnp.bfloat16)                  # (C, tile_hw)
    valid = (tgt >= 0) & (tgt < n_classes)                        # (1, tile_hw)
    true_oh = ((row == tgt) & valid).astype(jnp.bfloat16)         # (C, tile_hw)

    # conf[i, j] += #pixels with (true == i, pred == j): contract over lanes.
    conf_tile = lax.dot_general(
        true_oh, pred_oh,
        dimension_numbers=(((1,), (1,)), ((), ())),
        preferred_element_type=jnp.float32,
    )                                                             # (C, C)
    conf_ref[...] += conf_tile[None, :, :]


def confusion_matrix_pallas(logits_bcp, target_b1p, n_classes, *,
                            tile_hw, tiles_per_slice, num_partials):
    """logits_bcp: (B, C, HW_pad) f32, target_b1p: (B, 1, HW_pad) i32
       -> (C, C) f32 confusion matrix."""
    b, c, hw_pad = logits_bcp.shape
    assert c == n_classes
    assert hw_pad == num_partials * tiles_per_slice * tile_hw

    kernel = functools.partial(_confusion_kernel, n_classes=n_classes)

    def logits_map(p, bi, t):
        return (bi, 0, p * tiles_per_slice + t)

    def target_map(p, bi, t):
        return (bi, 0, p * tiles_per_slice + t)

    partials = pl.pallas_call(
        kernel,
        out_shape=jax.ShapeDtypeStruct((num_partials, c, c), jnp.float32),
        grid_spec=pltpu.PrefetchScalarGridSpec(
            num_scalar_prefetch=0,
            grid=(num_partials, b, tiles_per_slice),
            in_specs=[
                pl.BlockSpec((1, c, tile_hw), logits_map),
                pl.BlockSpec((1, 1, tile_hw), target_map),
            ],
            out_specs=pl.BlockSpec((1, c, c), lambda p, bi, t: (p, 0, 0)),
        ),
        compiler_params=pltpu.CompilerParams(
            dimension_semantics=("parallel", "arbitrary", "arbitrary"),
        ),
    )(logits_bcp, target_b1p)
    return partials.sum(axis=0)


def dice_score_coefficient(output_nchw, target_nhw, n_classes, *,
                           max_tile_hw=32768,
                           vmem_budget_bytes=2 * 1024 * 1024):
    """Forward pass of DiceScoreCoefficient. Returns per-class f2, shape (C,)."""
    b, c, h, w = output_nchw.shape
    assert c == n_classes
    hw = h * w

    # Largest lane-dense pixel tile whose f32 logits slab fits the per-buffer
    # VMEM budget (double-buffered inputs + bf16 one-hot temporaries stay well
    # inside the default scoped VMEM on v5e/v6e/v7x).
    cap = (vmem_budget_bytes // (4 * c)) // 128 * 128
    cap = max(128, min(max_tile_hw, cap))
    hw_rounded = ((hw + 127) // 128) * 128
    tile_hw = min(cap, hw_rounded)

    tiles_total = -(-hw // tile_hw)                           # cdiv
    num_partials = max(1, min(NUM_PARTIALS, tiles_total))
    tiles_per_slice = -(-tiles_total // num_partials)
    hw_pad = num_partials * tiles_per_slice * tile_hw

    # No transpose: NCHW -> (B, C, HW). Classes on sublanes, pixels on lanes.
    logits = output_nchw.reshape(b, c, hw).astype(jnp.float32)
    target = target_nhw.reshape(b, 1, hw).astype(jnp.int32)
    if hw_pad != hw:
        logits = jnp.pad(logits, ((0, 0), (0, 0), (0, hw_pad - hw)))
        # Pad target with -1 (out of range) so padded pixels are masked out.
        target = jnp.pad(target, ((0, 0), (0, 0), (0, hw_pad - hw)),
                         constant_values=-1)

    conf = confusion_matrix_pallas(
        logits, target, n_classes,
        tile_hw=tile_hw, tiles_per_slice=tiles_per_slice,
        num_partials=num_partials)

    # _dsc epilogue (tiny (C, C) work) in plain JAX, replicating the guards.
    diag = jnp.diagonal(conf)            # tp_tn
    fp_all = conf.sum(axis=1)            # row sums    (mat.sum(axis=1))
    fn_all = conf.sum(axis=0)            # column sums (mat.sum(axis=0))

    guard = (fp_all != 0) & (fn_all != 0)
    precision = jnp.where(guard, diag / jnp.where(fp_all != 0, fp_all, 1.0), 0.0)
    recall = jnp.where(guard, diag / jnp.where(fn_all != 0, fn_all, 1.0), 0.0)

    pr_guard = (precision != 0) & (recall != 0)
    denom = jnp.where(precision + recall != 0, precision + recall, 1.0)
    f2 = jnp.where(pr_guard, 2.0 * precision * recall / denom, 0.0)
    return f2.astype(jnp.float32)


if __name__ == "__main__":
    B, C, H, W = 2, 4, 16, 16
    key = jax.random.PRNGKey(0)
    k_out, k_tgt = jax.random.split(key)

    output = jax.random.normal(k_out, (B, C, H, W), dtype=jnp.float32)
    target = jax.random.randint(k_tgt, (B, H, W), 0, C, dtype=jnp.int32)

    f2 = jax.jit(dice_score_coefficient, static_argnums=2)(output, target, C)
    f2 = jax.block_until_ready(f2)

    assert f2.shape == (C,) and f2.dtype == jnp.float32
    print("KERNEL_OK")
</pallas_src>

<mosaic_0001>
module attributes {stable_mosaic.version = 11 : i64} {
  func.func @_confusion_kernel(%arg0: i32, %arg1: i32, %arg2: i32, %arg3: memref<1x4x256xf32, #tpu.memory_space<vmem>>, %arg4: memref<1x1x256xi32, #tpu.memory_space<vmem>>, %arg5: memref<1x4x4xf32, #tpu.memory_space<vmem>>) attributes {dimension_semantics = [#tpu.dimension_semantics<parallel>, #tpu.dimension_semantics<arbitrary>, #tpu.dimension_semantics<arbitrary>], iteration_bounds = array<i64: 1, 2, 1>, scalar_prefetch = 0 : i64, scratch_operands = 0 : i64, tpu.core_type = #tpu.core_type<tc>, window_params = [{transform_indices = @transform_0, window_bounds = array<i64: 1, 4, 256>}, {transform_indices = @transform_1, window_bounds = array<i64: 1, 1, 256>}, {transform_indices = @transform_2, window_bounds = array<i64: 1, 4, 4>}]} {
    %c0_i32 = arith.constant 0 : i32
    %0 = arith.cmpi eq, %arg1, %c0_i32 : i32
    %c0_i32_0 = arith.constant 0 : i32
    %1 = arith.cmpi eq, %arg2, %c0_i32_0 : i32
    %2 = arith.andi %0, %1 : i1
    %3 = arith.extui %2 : i1 to i32
    %c0_i32_1 = arith.constant 0 : i32
    %4 = arith.cmpi ne, %3, %c0_i32_1 : i32
    scf.if %4 {
      %cst_17 = arith.constant 0.000000e+00 : f32
      %40 = vector.broadcast %cst_17 : f32 to vector<1x4x4xf32>
      %c0_18 = arith.constant 0 : index
      %c0_19 = arith.constant 0 : index
      %c0_20 = arith.constant 0 : index
      %41 = vector.load %arg5[%c0_18, %c0_19, %c0_20] : memref<1x4x4xf32, #tpu.memory_space<vmem>>, vector<1x4x4xf32>
      tpu.vector_store %arg5[%c0_18, %c0_19, %c0_20], %40 {strides = array<i32>} : memref<1x4x4xf32, #tpu.memory_space<vmem>>, vector<1x4x4xf32>,
    } else {
    }
    %c0 = arith.constant 0 : index
    %c0_2 = arith.constant 0 : index
    %c0_3 = arith.constant 0 : index
    %5 = vector.load %arg3[%c0, %c0_2, %c0_3] : memref<1x4x256xf32, #tpu.memory_space<vmem>>, vector<1x4x256xf32>
    %6 = vector.shape_cast %5 : vector<1x4x256xf32> to vector<4x256xf32>
    %c0_4 = arith.constant 0 : index
    %c0_5 = arith.constant 0 : index
    %c0_6 = arith.constant 0 : index
    %7 = vector.load %arg4[%c0_4, %c0_5, %c0_6] : memref<1x1x256xi32, #tpu.memory_space<vmem>>, vector<1x1x256xi32>
    %8 = vector.shape_cast %7 : vector<1x1x256xi32> to vector<1x256xi32>
    %9 = tpu.iota {dimensions = array<i32: 0>} : vector<4x256xi32>
    %cst = arith.constant dense<0xFF800000> : vector<256xf32>
    %10 = vector.multi_reduction <maximumf>, %6, %cst [0] : vector<4x256xf32> to vector<256xf32>
    %11 = vector.shape_cast %10 : vector<256xf32> to vector<1x256xf32>
    %12 = vector.broadcast %11 : vector<1x256xf32> to vector<4x256xf32>
    %13 = arith.cmpf oeq, %6, %12 : vector<4x256xf32>
    %c4_i32 = arith.constant 4 : i32
    %14 = vector.broadcast %c4_i32 : i32 to vector<4x256xi32>
    %15 = arith.select %13, %9, %14 : vector<4x256xi1>, vector<4x256xi32>
    %cst_7 = arith.constant dense<2147483647> : vector<256xi32>
    %16 = vector.multi_reduction <minsi>, %15, %cst_7 [0] : vector<4x256xi32> to vector<256xi32>
    %17 = vector.shape_cast %16 : vector<256xi32> to vector<1x256xi32>
    %18 = vector.broadcast %17 : vector<1x256xi32> to vector<4x256xi32>
    %19 = arith.cmpi eq, %9, %18 : vector<4x256xi32>
    %20 = arith.extui %19 : vector<4x256xi1> to vector<4x256xi32>
    %21 = arith.sitofp %20 : vector<4x256xi32> to vector<4x256xf32>
    %22 = arith.truncf %21 : vector<4x256xf32> to vector<4x256xbf16>
    %c0_i32_8 = arith.constant 0 : i32
    %23 = vector.broadcast %c0_i32_8 : i32 to vector<1x256xi32>
    %24 = arith.cmpi sge, %8, %23 : vector<1x256xi32>
    %c4_i32_9 = arith.constant 4 : i32
    %25 = vector.broadcast %c4_i32_9 : i32 to vector<1x256xi32>
    %26 = arith.cmpi slt, %8, %25 : vector<1x256xi32>
    %27 = arith.andi %24, %26 : vector<1x256xi1>
    %28 = vector.broadcast %8 : vector<1x256xi32> to vector<4x256xi32>
    %29 = arith.cmpi eq, %9, %28 : vector<4x256xi32>
    %30 = vector.broadcast %27 : vector<1x256xi1> to vector<4x256xi1>
    %31 = arith.andi %29, %30 : vector<4x256xi1>
    %32 = arith.extui %31 : vector<4x256xi1> to vector<4x256xi32>
    %33 = arith.sitofp %32 : vector<4x256xi32> to vector<4x256xf32>
    %34 = arith.truncf %33 : vector<4x256xf32> to vector<4x256xbf16>
    %cst_10 = arith.constant dense<0.000000e+00> : vector<4x4xf32>
    %35 = tpu.matmul %34, %22, %cst_10 {dimension_numbers = #tpu.dot_dimension_numbers<[1], [1], [0], [0], [0, 0, 1, 0], [], []>} : vector<4x256xbf16>, vector<4x256xbf16>, vector<4x4xf32> -> vector<4x4xf32>
    %c0_11 = arith.constant 0 : index
    %c0_12 = arith.constant 0 : index
    %c0_13 = arith.constant 0 : index
    %36 = vector.load %arg5[%c0_11, %c0_12, %c0_13] : memref<1x4x4xf32, #tpu.memory_space<vmem>>, vector<1x4x4xf32>
    %37 = vector.shape_cast %35 : vector<4x4xf32> to vector<1x4x4xf32>
    %38 = arith.addf %36, %37 : vector<1x4x4xf32>
    %c0_14 = arith.constant 0 : index
    %c0_15 = arith.constant 0 : index
    %c0_16 = arith.constant 0 : index
    %39 = vector.load %arg5[%c0_14, %c0_15, %c0_16] : memref<1x4x4xf32, #tpu.memory_space<vmem>>, vector<1x4x4xf32>
    tpu.vector_store %arg5[%c0_14, %c0_15, %c0_16], %38 {strides = array<i32>} : memref<1x4x4xf32, #tpu.memory_space<vmem>>, vector<1x4x4xf32>,
    return
  }
  func.func @transform_0(%arg0: i32, %arg1: i32, %arg2: i32) -> (i32, i32, i32) {
    %c1_i32 = arith.constant 1 : i32
    %0 = arith.muli %arg0, %c1_i32 : i32
    %1 = arith.addi %0, %arg2 : i32
    %c0_i32 = arith.constant 0 : i32
    %c0_i32_0 = arith.constant 0 : i32
    return %arg1, %c0_i32, %1 : i32, i32, i32
  }
  func.func @transform_1(%arg0: i32, %arg1: i32, %arg2: i32) -> (i32, i32, i32) {
    %c1_i32 = arith.constant 1 : i32
    %0 = arith.muli %arg0, %c1_i32 : i32
    %1 = arith.addi %0, %arg2 : i32
    %c0_i32 = arith.constant 0 : i32
    %c0_i32_0 = arith.constant 0 : i32
    return %arg1, %c0_i32, %1 : i32, i32, i32
  }
  func.func @transform_2(%arg0: i32, %arg1: i32, %arg2: i32) -> (i32, i32, i32) {
    %c0_i32 = arith.constant 0 : i32
    %c0_i32_0 = arith.constant 0 : i32
    %c0_i32_1 = arith.constant 0 : i32
    return %arg0, %c0_i32, %c0_i32_0 : i32, i32, i32
  }
}

</mosaic_0001>

<bundles_post_ra>
// kernel: dice_score_coefficient.1
= control target key start
LH: loop header
LB: loop body
LE: loop exit
PB: predicated region body
PF: predicated region fallthrough
CT: control target
= control target key end

     0   :  { %s553_s9 = smov 0   ;;  %s555_s10 = smov 0   ;;  %s609_s0 = inlined_call_operand.vmem [shape: f32[2,4,256], index: 0, kind: input, shape index: {}]   ;;  %s610_s1 = inlined_call_operand.vmem [shape: s32[2,1,256], index: 1, kind: input, shape index: {}]   ;;  %s611_s2 = inlined_call_operand.vmem [shape: f32[1,4,4], index: 2, kind: output, shape index: {}]  }
   0x1   :  { %s557_s11 = smov 0  }
   0x2 LB: > { %s27_s12 = sadd.s32 1, %s528_s10  ;;  %p459_p0 = scmp.ge.s32.totalorder %s532_s11, 1  ;;  %s532_s11 = sphi %s557_s11, %s12_s11   ;;  %s528_s10 = sphi %s555_s10, %s613_s10   ;;  %s524_s9 = sphi %s553_s9, %s612_s9  }
   0x3   : > { %p29_p1 = scmp.ge.s32.totalorder %s27_s12, 2  ;;  %p162_p2 = scmp.lt.s32.totalorder %s532_s11, 3 }
   0x5   : > { %s615_s12 = smov (%p29_p1, %s27_s12), 0  ;;  %p163_p3 = pnand %p459_p0, %p162_p2 }
   0x6   : > { %p199_p4 = scmp.lt.s32.totalorder (!%p163_p3), %s524_s9, 1  ;;  %p225_p5 = scmp.eq.s32.totalorder (!%p163_p3), %s524_s9, 0 }
   0x7   : > { %166 = sbr.rel (%p163_p3) target bundleno = 281 (0x119), region = 28 }
   0xe   : > { %s617_s9 = smov (!%p199_p4, %s524_s9), 1  ;;  %230 = sbr.rel (!%p225_p5) target bundleno = 21 (0x15), region = 32 }
   0xf   : > { %s479_s13 = sshll.u32 %s617_s9, 3  ;;  %s462_s14 = sshll.u32 %s617_s9, 1  ;;  %vm231_vm0 = vcmask (%p225_p5), 27648   ;;  %v534_v0 = vmov (%p225_p5), 0.0  }
  0x10   : > { %s206_s17 = scalar_lea.vmem %s609_s0, %s479_s13  ;;  %s217_s20 = scalar_lea.vmem %s610_s1, %s462_s14  ;;  %232 = vst.msk [vmem:[%s611_s2] sm:$0xf] (%p225_p5), %vm231_vm0, %v534_v0 }
  0x15 PF: > { %v233_v1 = vld [vmem:[%s206_s17] sm:$0xff]  ;;  %v235_v2 = vlaneseq  ;;  %vm240_vm1 = vcmask 1043456   ;;  %v535_v9 = vmov 839922192   ;;  %v536_v14 = vmov 0  }
  0x16   : > { %v238_v3 = vcombine.high %v233_v1, %v233_v1  ;;  %v241_v4 = vsel %vm240_vm1, %v233_v1, -inf  ;;  %v234_v5 = vld [vmem:[%s217_s20] sm:$0x3]  ;;  %v261_v10 = vunpack.c.l.s4 %v535_v9  ;;  %v537_v28 = vmov 1.0|1.0  }
  0x17   : > { %v581_v6 = vshrl.u32 %v235_v2, 7  ;;  %v242_v7 = vrot.slane %v241_v4, 4  ;;  %vm297_vm2 = vcmp.ge.s32.totalorder %v234_v5, 0  ;;  %vm298_vm3 = vcmp.lt.s32.totalorder %v234_v5, 4  ;;  %v369_v51 = vld [vmem:[%s611_s2] sm:$0xf] }
  0x18   : > { %v248_v8 = vsel %vm240_vm1, %v238_v3, -inf  ;;  %vm299_vm4 = vmand %vm297_vm2, %vm298_vm3  ;;  %v262_v19 = vunpack.c.0.s8 %v261_v10 }
  0x19   : > { %v243_v11 = vmax.f32 %v241_v4, %v242_v7  ;;  %v249_v12 = vrot.slane %v248_v8, 4  ;;  %v306_v13 = vsub.s32 1, %v581_v6  ;;  %v310_v15 = vsel %vm299_vm4, 1, %v536_v14 }
  0x1a   : > { %v265_v25 = vsub.s32 %v262_v19, %v581_v6  ;;  %v302_v43 = vsub.s32 0, %v581_v6 }
  0x1b   : > { %v244_v16 = vrot.slane %v243_v11, 2  ;;  %v250_v17 = vmax.f32 %v248_v8, %v249_v12  ;;  %v307_v18 = vrot.slane %v234_v5, %v306_v13  ;;  %v318_v20 = vrot.slane %v310_v15, %v306_v13 }
  0x1c   : > { %v266_v30 = vrot.slane %v581_v6, %v265_v25  ;;  %v314_v48 = vrot.slane %v310_v15, %v302_v43  ;;  %v303_v49 = vrot.slane %v234_v5, %v302_v43 }
  0x1d   : > { %v245_v21 = vmax.f32 %v243_v11, %v244_v16  ;;  %v251_v22 = vrot.slane %v250_v17, 2  ;;  %vm309_vm5 = vcmp.eq.s32.totalorder %v581_v6, %v307_v18  ;;  %vm320_vm6 = vcmp.eq.s32.totalorder %v318_v20, 1 }
  0x1e   : > { %vm322_vm7 = vmand %vm309_vm5, %vm320_vm6  ;;  %vm308_vm4 = vcmp.eq.s32.totalorder %v581_v6, %v303_v49  ;;  %vm319_vm5 = vcmp.eq.s32.totalorder %v314_v48, 1 }
  0x1f   : > { %v246_v23 = vrot.slane %v245_v21, 1  ;;  %v252_v24 = vmax.f32 %v250_v17, %v251_v22  ;;  %vm472_vm8 = vmpackc.low %vm322_vm7, %vm322_vm7 }
  0x20   : > { %473 = vmatprep.mubr.msk.bf16.mxu0 %vm472_vm8, %v537_v28  ;;  %vm321_vm6 = vmand %vm308_vm4, %vm319_vm5  ;;  %vm371_vm8 = vcmask 27648  }
  0x21   : > { %v247_v26 = vmax.f32 %v245_v21, %v246_v23  ;;  %v253_v27 = vrot.slane %v252_v24, 1  ;;  %vm474_vm7 = vmpackc.low %vm321_vm6, %vm321_vm6 }
  0x23   : > { %v254_v29 = vmax.f32 %v252_v24, %v253_v27 }
  0x25   : > { %v257_v31 = vcombine.low %v247_v26, %v254_v29 }
  0x27   : > { %vm259_vm9 = vcmp.eq.f32.partialorder %v233_v1, %v257_v31 }
  0x28   : > { %v267_v32 = vsel %vm259_vm9, %v266_v30, 4 }
  0x29   : > { %v268_v33 = vcombine.high %v267_v32, %v267_v32  ;;  %v269_v34 = vsel %vm240_vm1, %v267_v32, 2147483647 }
  0x2a   : > { %v270_v35 = vrot.slane %v269_v34, 4 }
  0x2b   : > { %v279_v36 = vsel %vm240_vm1, %v268_v33, 2147483647 }
  0x2c   : > { %v280_v37 = vrot.slane %v279_v36, 4  ;;  %vm271_vm10 = vcmp.lt.s32.totalorder %v269_v34, %v270_v35 }
  0x2d   : > { %v272_v38 = vsel %vm271_vm10, %v269_v34, %v270_v35 }
  0x2e   : > { %vm281_vm11 = vcmp.lt.s32.totalorder %v279_v36, %v280_v37  ;;  %v273_v39 = vrot.slane %v272_v38, 2 }
  0x2f   : > { %v282_v40 = vsel %vm281_vm11, %v279_v36, %v280_v37 }
  0x30   : > { %v283_v41 = vrot.slane %v282_v40, 2  ;;  %vm274_vm12 = vcmp.lt.s32.totalorder %v272_v38, %v273_v39 }
  0x31   : > { %v275_v42 = vsel %vm274_vm12, %v272_v38, %v273_v39 }
  0x32   : > { %vm284_vm13 = vcmp.lt.s32.totalorder %v282_v40, %v283_v41  ;;  %v276_v44 = vrot.slane %v275_v42, 1 }
  0x33   : > { %v285_v45 = vsel %vm284_vm13, %v282_v40, %v283_v41 }
  0x34   : > { %v286_v46 = vrot.slane %v285_v45, 1  ;;  %vm277_vm14 = vcmp.lt.s32.totalorder %v275_v42, %v276_v44 }
  0x35   : > { %v278_v47 = vsel %vm277_vm14, %v275_v42, %v276_v44 }
  0x36   : > { %vm287_vm15 = vcmp.lt.s32.totalorder %v285_v45, %v286_v46  ;;  %vm289_vm0 = vcmp.eq.s32.totalorder %v581_v6, %v278_v47 }
  0x37   : > { %v288_v50 = vsel %vm287_vm15, %v285_v45, %v286_v46  ;;  %vm470_vm2 = vmpackc.low %vm289_vm0, %vm289_vm0 }
  0x38   : > { %vm290_vm1 = vcmp.eq.s32.totalorder %v581_v6, %v288_v50 }
  0x39   : > { %vm468_vm3 = vmpackc.low %vm290_vm1, %vm290_vm1 }
  0x3a   : > { %469 = vmatprep.subr.msk.bf16.mxu0 %vm468_vm3, %v537_v28 }
  0x3b   : > { %471 = vmatpush1.bf16.xpose.msk.msra.mxu0 %vm470_vm2, %v537_v28 }
  0x42   : > { %475 = vmatmul.mubr.msk.bf16.vlgmr.msra.gmra.mrb[0].mxu0 %vm474_vm7, %v537_v28 }
 0x115   : > { %v363_v52 = vpop.f32.mrb[0].mxu0 }
 0x116   : > { %v370_v53 = vadd.f32 %v369_v51, %v363_v52  ;;  %v365_v54 = vpop.f32.mrb[1].mxu0 }
 0x117   : > { %v366_v55 = vpop.f32.mrb[2].mxu0 }
 0x118   : > { %372 = vst.msk [vmem:[%s611_s2] sm:$0xf] %vm371_vm8, %v370_v53  ;;  %v367_v56 = vpop.f32.mrb[3].mxu0 }
 0x119 PF: > { %s12_s11 = sadd.s32 1, %s532_s11   ;;  %s612_s9 = smov %s528_s10 }
 0x11a   : > { %p9_p6 = scmp.ge.s32.totalorder %s12_s11, 4   ;;  %s613_s10 = smov %s615_s12 }
 0x11c   :  { %11 = sbr.rel (!%p9_p6) target bundleno = 2 (0x2), region = 65 }

</bundles_post_ra>
